<compile_context>
chip_gen: v7x
topology: tpu7x:2x2x1
jax: 0.10.0
libtpu: 0.0.40
codegen_flags: <defaults>
</compile_context>

<pallas_src>
import jax
import jax.numpy as jnp
from jax.experimental import pallas as pl
from jax.experimental.pallas import tpu as pltpu


def capacity_cnn_kernel(x_ref, wc_ref, bc_ref, wl_ref, bl_ref, out_ref):
    # x_ref:  (bb, L, Kp)   f32 im2col'd input tile (3 conv taps stacked on the lane axis)
    # wc_ref: (Kp, Dp)      bf16 fused conv weight (taps stacked along K, D padded to Dp)
    # bc_ref: (1, Dp)       f32 conv bias (zero-padded)
    # wl_ref: (1, Dp)       f32 final linear weight row, pre-scaled by 1/L (zero-padded)
    # bl_ref: (1, 1)        f32 final linear bias
    # out_ref:(1, 1, bb)    f32 per-example capacity, batch on the lane axis
    bb, L, Kp = x_ref.shape
    Dp = wc_ref.shape[1]

    # In-kernel bf16 cast (free VPU work hidden under the input DMA).
    x = x_ref[...].astype(jnp.bfloat16).reshape(bb * L, Kp)

    # Single fused-K MXU matmul over all 3 conv taps, f32 accumulation.
    conv = jnp.dot(x, wc_ref[...], preferred_element_type=jnp.float32)      # (bb*L, Dp)
    h = jnp.maximum(conv + bc_ref[...], 0.0)                                 # embedding ReLU

    # AdaptiveAvgPool1d(1): sum over L (the 1/L scale is folded into wl in the wrapper).
    pooled = jnp.sum(h.reshape(bb, L, Dp), axis=1)                           # (bb, Dp)

    # Final Linear(D, 1) on the VPU/XLU: broadcast-mul + lane reduce.
    # (post-pool ReLU of the original module is a no-op since h >= 0.)
    out_vec = jnp.sum(pooled * wl_ref[...], axis=-1) + bl_ref[0, 0]          # (bb,)
    out_ref[...] = out_vec.reshape(1, 1, bb).astype(out_ref.dtype)           # lane-dense store


def capacity_cnn(x, wc, bc, wl, bl, *, block_b=512):
    """x: (B, L, Cin) f32; wc: (3, Cin, D); bc: (1, D); wl: (D, 1); bl: (1, 1)."""
    B, L, Cin = x.shape
    D = wc.shape[2]
    Dp = pl.cdiv(D, 128) * 128            # lane-dense padded feature width
    Kc = 3 * Cin
    Kp = pl.cdiv(Kc, 16) * 16             # sublane-aligned bf16 contraction depth

    # Batch tiling (grid axis).
    bb = min(block_b, B)
    nb = pl.cdiv(B, bb)
    # v7x megacore: with a multi-tile grid, prefer an even tile count so
    # dimension_semantics=("parallel",) shards batch tiles across both TensorCores.
    if nb > 1 and nb % 2 == 1:
        bb = max(8, pl.cdiv(pl.cdiv(B, nb + 1), 8) * 8)
        nb = pl.cdiv(B, bb)
    B_pad = nb * bb

    # --- wrapper-side preparation (pure layout plumbing, tiny tensors) -------------
    # im2col: zero-pad the sequence axis (Conv1d padding=1) and stack the 3 taps on
    # the channel axis; pad K up to 16 and keep everything f32 (cast happens in-kernel).
    x_pad = jnp.pad(x.astype(jnp.float32), ((0, B_pad - B), (1, 1), (0, 0)))   # (B_pad, L+2, Cin)
    x_cat = jnp.concatenate(
        [x_pad[:, 0:L, :], x_pad[:, 1:L + 1, :], x_pad[:, 2:L + 2, :]], axis=-1)  # (B_pad, L, 3*Cin)
    x_cat = jnp.pad(x_cat, ((0, 0), (0, 0), (0, Kp - Kc)))                      # (B_pad, L, Kp)

    wc_f = jnp.pad(wc.reshape(Kc, D).astype(jnp.float32),
                   ((0, Kp - Kc), (0, Dp - D))).astype(jnp.bfloat16)            # (Kp, Dp)
    bc_f = jnp.pad(bc.astype(jnp.float32), ((0, 0), (0, Dp - D)))               # (1, Dp)
    wl_f = jnp.pad(wl.T.astype(jnp.float32), ((0, 0), (0, Dp - D))) * (1.0 / L) # (1, Dp), 1/L folded in
    bl_f = bl.astype(jnp.float32)                                               # (1, 1)

    flops = 2 * B_pad * L * Kp * Dp + 3 * B_pad * Dp
    bytes_accessed = (B_pad * L * Kp * 4          # x_cat (f32)
                      + Kp * Dp * 2               # conv weight (bf16)
                      + (2 * Dp + 1) * 4          # biases / linear weight (f32)
                      + B_pad * 4)                # output (f32)

    out = pl.pallas_call(
        capacity_cnn_kernel,
        out_shape=jax.ShapeDtypeStruct((nb, 1, bb), jnp.float32),
        grid=(nb,),
        in_specs=[
            pl.BlockSpec((bb, L, Kp), lambda i: (i, 0, 0)),   # batch tile (auto-pipelined)
            pl.BlockSpec((Kp, Dp), lambda i: (0, 0)),         # resident fused conv weight
            pl.BlockSpec((1, Dp), lambda i: (0, 0)),          # conv bias
            pl.BlockSpec((1, Dp), lambda i: (0, 0)),          # linear weight row (pre-scaled)
            pl.BlockSpec((1, 1), lambda i: (0, 0)),           # linear bias
        ],
        out_specs=pl.BlockSpec((1, 1, bb), lambda i: (i, 0, 0)),   # lane-dense output rows
        compiler_params=pltpu.CompilerParams(
            dimension_semantics=("parallel",),       # megacore sharding on v7x
            vmem_limit_bytes=48 * 1024 * 1024,       # <= v7x 64 MiB VMEM with headroom
        ),
        cost_estimate=pl.CostEstimate(
            flops=int(flops), transcendentals=0, bytes_accessed=int(bytes_accessed)),
    )(x_cat, wc_f, bc_f, wl_f, bl_f)

    return out.reshape(B_pad)[:B].reshape(B, 1)


def reference(x, wc, bc, wl, bl):
    # Pure-JAX reference of the same forward pass, with the same bf16 operand
    # quantization as the kernel's MXU matmul (accumulation in f32).
    B, L, Cin = x.shape
    xb = x.astype(jnp.bfloat16).astype(jnp.float32)
    wcb = wc.astype(jnp.bfloat16).astype(jnp.float32)
    xp = jnp.pad(xb, ((0, 0), (1, 1), (0, 0)))
    conv = sum(jnp.einsum("blc,cd->bld", xp[:, k:k + L], wcb[k]) for k in range(3)) + bc
    h = jax.nn.relu(conv)
    pooled = jax.nn.relu(h.mean(axis=1))
    return pooled @ wl + bl[0, 0]


if __name__ == "__main__":
    B, L = 2, 16          # batch, sequence length
    in_dim, d_model = 4, 32

    key = jax.random.PRNGKey(0)
    kx, kw1, kb1, kw2, kb2 = jax.random.split(key, 5)

    x = jax.random.normal(kx, (B, L, in_dim), dtype=jnp.float32)
    wc = jax.random.normal(kw1, (3, in_dim, d_model), dtype=jnp.float32) * 0.2
    bc = jax.random.normal(kb1, (1, d_model), dtype=jnp.float32) * 0.1
    wl = jax.random.normal(kw2, (d_model, 1), dtype=jnp.float32) * 0.2
    bl = jax.random.normal(kb2, (1, 1), dtype=jnp.float32) * 0.1

    out = jax.block_until_ready(capacity_cnn(x, wc, bc, wl, bl))
    ref = jax.block_until_ready(reference(x, wc, bc, wl, bl))

    assert out.shape == (B, 1), out.shape
    assert jnp.allclose(out, ref, atol=1e-3, rtol=1e-3), (out, ref)
    print("KERNEL_OK")
</pallas_src>

<mosaic_0001>
module attributes {stable_mosaic.version = 11 : i64} {
  func.func @capacity_cnn_kernel(%arg0: i32, %arg1: memref<2x16x16xf32, #tpu.memory_space<vmem>>, %arg2: memref<16x128xbf16, #tpu.memory_space<vmem>>, %arg3: memref<1x128xf32, #tpu.memory_space<vmem>>, %arg4: memref<1x128xf32, #tpu.memory_space<vmem>>, %arg5: memref<1x1xf32, #tpu.memory_space<vmem>>, %arg6: memref<1x1x2xf32, #tpu.memory_space<vmem>>) attributes {dimension_semantics = [#tpu.dimension_semantics<parallel>], iteration_bounds = array<i64: 1>, scalar_prefetch = 0 : i64, scratch_operands = 0 : i64, tpu.core_type = #tpu.core_type<tc>, window_params = [{transform_indices = @transform_0, window_bounds = array<i64: 2, 16, 16>}, {pipeline_mode = #tpu.pipeline_mode<synchronous>, transform_indices = @transform_1, window_bounds = array<i64: 16, 128>}, {pipeline_mode = #tpu.pipeline_mode<synchronous>, transform_indices = @transform_2, window_bounds = array<i64: 1, 128>}, {pipeline_mode = #tpu.pipeline_mode<synchronous>, transform_indices = @transform_3, window_bounds = array<i64: 1, 128>}, {pipeline_mode = #tpu.pipeline_mode<synchronous>, transform_indices = @transform_4, window_bounds = array<i64: 1, 1>}, {transform_indices = @transform_5, window_bounds = array<i64: 1, 1, 2>}]} {
    %c0 = arith.constant 0 : index
    %c0_0 = arith.constant 0 : index
    %c0_1 = arith.constant 0 : index
    %0 = vector.load %arg1[%c0, %c0_0, %c0_1] : memref<2x16x16xf32, #tpu.memory_space<vmem>>, vector<2x16x16xf32>
    %1 = arith.truncf %0 : vector<2x16x16xf32> to vector<2x16x16xbf16>
    %2 = vector.shape_cast %1 : vector<2x16x16xbf16> to vector<32x16xbf16>
    %c0_2 = arith.constant 0 : index
    %c0_3 = arith.constant 0 : index
    %3 = vector.load %arg2[%c0_2, %c0_3] : memref<16x128xbf16, #tpu.memory_space<vmem>>, vector<16x128xbf16>
    %cst = arith.constant dense<0.000000e+00> : vector<32x128xf32>
    %4 = tpu.matmul %2, %3, %cst {dimension_numbers = #tpu.dot_dimension_numbers<[1], [0], [0], [1], [0, 0, 1, 1], [], []>} : vector<32x16xbf16>, vector<16x128xbf16>, vector<32x128xf32> -> vector<32x128xf32>
    %c0_4 = arith.constant 0 : index
    %c0_5 = arith.constant 0 : index
    %5 = vector.load %arg3[%c0_4, %c0_5] : memref<1x128xf32, #tpu.memory_space<vmem>>, vector<1x128xf32>
    %6 = vector.broadcast %5 : vector<1x128xf32> to vector<32x128xf32>
    %7 = arith.addf %4, %6 : vector<32x128xf32>
    %cst_6 = arith.constant 0.000000e+00 : f32
    %8 = vector.broadcast %cst_6 : f32 to vector<32x128xf32>
    %9 = arith.maximumf %7, %8 : vector<32x128xf32>
    %10 = vector.shape_cast %9 : vector<32x128xf32> to vector<2x16x128xf32>
    %cst_7 = arith.constant dense<0.000000e+00> : vector<2x128xf32>
    %11 = vector.multi_reduction <add>, %10, %cst_7 [1] : vector<2x16x128xf32> to vector<2x128xf32>
    %c0_8 = arith.constant 0 : index
    %c0_9 = arith.constant 0 : index
    %12 = vector.load %arg4[%c0_8, %c0_9] : memref<1x128xf32, #tpu.memory_space<vmem>>, vector<1x128xf32>
    %13 = vector.broadcast %12 : vector<1x128xf32> to vector<2x128xf32>
    %14 = arith.mulf %11, %13 : vector<2x128xf32>
    %cst_10 = arith.constant dense<0.000000e+00> : vector<2xf32>
    %15 = vector.multi_reduction <add>, %14, %cst_10 [1] : vector<2x128xf32> to vector<2xf32>
    %c0_11 = arith.constant 0 : index
    %c0_12 = arith.constant 0 : index
    %16 = vector.load %arg5[%c0_11, %c0_12] : memref<1x1xf32, #tpu.memory_space<vmem>>, vector<1x1xf32>
    %17 = vector.extract %16[0, 0] : f32 from vector<1x1xf32>
    %18 = vector.broadcast %17 : f32 to vector<2xf32>
    %19 = arith.addf %15, %18 : vector<2xf32>
    %20 = vector.shape_cast %19 : vector<2xf32> to vector<1x1x2xf32>
    %c0_13 = arith.constant 0 : index
    %c0_14 = arith.constant 0 : index
    %c0_15 = arith.constant 0 : index
    %21 = vector.load %arg6[%c0_13, %c0_14, %c0_15] : memref<1x1x2xf32, #tpu.memory_space<vmem>>, vector<1x1x2xf32>
    tpu.vector_store %arg6[%c0_13, %c0_14, %c0_15], %20 {strides = array<i32>} : memref<1x1x2xf32, #tpu.memory_space<vmem>>, vector<1x1x2xf32>,
    return
  }
  func.func @transform_0(%arg0: i32) -> (i32, i32, i32) {
    %c0_i32 = arith.constant 0 : i32
    %c0_i32_0 = arith.constant 0 : i32
    %c0_i32_1 = arith.constant 0 : i32
    return %arg0, %c0_i32, %c0_i32_0 : i32, i32, i32
  }
  func.func @transform_1(%arg0: i32) -> (i32, i32) {
    %c0_i32 = arith.constant 0 : i32
    %c0_i32_0 = arith.constant 0 : i32
    %c0_i32_1 = arith.constant 0 : i32
    return %c0_i32, %c0_i32_0 : i32, i32
  }
  func.func @transform_2(%arg0: i32) -> (i32, i32) {
    %c0_i32 = arith.constant 0 : i32
    %c0_i32_0 = arith.constant 0 : i32
    %c0_i32_1 = arith.constant 0 : i32
    return %c0_i32, %c0_i32_0 : i32, i32
  }
  func.func @transform_3(%arg0: i32) -> (i32, i32) {
    %c0_i32 = arith.constant 0 : i32
    %c0_i32_0 = arith.constant 0 : i32
    %c0_i32_1 = arith.constant 0 : i32
    return %c0_i32, %c0_i32_0 : i32, i32
  }
  func.func @transform_4(%arg0: i32) -> (i32, i32) {
    %c0_i32 = arith.constant 0 : i32
    %c0_i32_0 = arith.constant 0 : i32
    %c0_i32_1 = arith.constant 0 : i32
    return %c0_i32, %c0_i32_0 : i32, i32
  }
  func.func @transform_5(%arg0: i32) -> (i32, i32, i32) {
    %c0_i32 = arith.constant 0 : i32
    %c0_i32_0 = arith.constant 0 : i32
    %c0_i32_1 = arith.constant 0 : i32
    return %arg0, %c0_i32, %c0_i32_0 : i32, i32, i32
  }
}

</mosaic_0001>

<bundles_post_ra>
// kernel: tpu_custom_call.1
= control target key start
LH: loop header
LB: loop body
LE: loop exit
PB: predicated region body
PF: predicated region fallthrough
CT: control target
= control target key end

     0   :  { %s374_s0 = inlined_call_operand.hbm [shape: f32[2,16,16], index: 0, kind: input, shape index: {}]   ;;  %s375_s1 = inlined_call_operand.hbm [shape: bf16[16,128], index: 1, kind: input, shape index: {}]   ;;  %s376_s2 = inlined_call_operand.vmem [shape: f32[1,128], index: 2, kind: input, shape index: {}]   ;;  %s377_s3 = inlined_call_operand.vmem [shape: f32[1,128], index: 3, kind: input, shape index: {}]   ;;  %s378_s4 = inlined_call_operand.<no memory space> [shape: f32[1,1], index: 4, kind: input, shape index: {}]   ;;  %s379_s5 = inlined_call_operand.hbm [shape: f32[1,1,2], index: 5, kind: output, shape index: {}]  }
   0x1   :  { %v10_v0 = vstv %s378_s4 }
   0x2   :  { %11 = vst [vmem:[#allocation2] sm:$0x1] %v10_v0 }
   0x3   :  { %12 = vsyncpa [#allocation4], 0 }
   0x4   :  { %13 = vsyncpa [#allocation7], 0 }
   0x5   :  { %14 = vsyncpa [#allocation5], 0  ;;  %s292_s20 = smov [#allocation3]   ;;  %s220_s24 = scalar_lea.hbm %s374_s0, 512 }
   0x6   :  { %s20_s21 = sshll.u32 %s292_s20, 4  ;;  %p221_p0 = scmp.ne.s32.totalorder %s374_s0, %s220_s24  ;;  %s21_s21 = int_to_ptr.vmem [resolvable:$true] %s20_s21 }
   0x7   :  { %p224_p1 = scmp.lt.u32.totalorder %s220_s24, %s374_s0 }
   0x9   :  { %p226_p2 = pnand %p224_p1, %p221_p0 }
   0xb   :  { %229 = shalt.err (!%p226_p2)
}
   0xc   :  { %s230_s4 = scalar_lea.vmem %s21_s21, 512  ;;  %p235_p4 = scmp.lt.s32.totalorder %s21_s21, %s21_s21 }
   0xd   :  { %p231_p3 = scmp.ne.s32.totalorder %s21_s21, %s230_s4  ;;  %p236_p5 = scmp.lt.s32.totalorder %s230_s4, %s230_s4 }
   0xf   :  { %p237_p6 = por %p236_p5, %p235_p4 }
  0x11   :  { %p238_p7 = pnand %p237_p6, %p231_p3 }
  0x13   :  { %241 = shalt.err (!%p238_p7)
}
  0x14   :  { %s293_s29 = smov 128   ;;  %s294_s30 = smov 8  }
  0x15   :  { %26 = dma.hbm_to_vmem [thread:$0]  %s374_s0, 512, %s21_s21, [#allocation4], %s293_s29, %s293_s29, %s294_s30  }
  0x16   :  { %s295_s8 = smov [#allocation6]   ;;  %s242_s12 = scalar_lea.hbm %s375_s1, 128 }
  0x17   :  { %s32_s9 = sshll.u32 %s295_s8, 4  ;;  %p243_p8 = scmp.ne.s32.totalorder %s375_s1, %s242_s12  ;;  %s33_s9 = int_to_ptr.vmem [resolvable:$true] %s32_s9 }
  0x18   :  { %p246_p9 = scmp.lt.u32.totalorder %s242_s12, %s375_s1 }
  0x1a   :  { %p248_p10 = pnand %p246_p9, %p243_p8 }
  0x1c   :  { %251 = shalt.err (!%p248_p10)
}
  0x1d   :  { %s252_s17 = scalar_lea.vmem %s33_s9, 128  ;;  %p257_p12 = scmp.lt.s32.totalorder %s33_s9, %s33_s9 }
  0x1e   :  { %p253_p11 = scmp.ne.s32.totalorder %s33_s9, %s252_s17  ;;  %p258_p13 = scmp.lt.s32.totalorder %s252_s17, %s252_s17 }
  0x20   :  { %p259_p0 = por %p258_p13, %p257_p12 }
  0x22   :  { %p260_p1 = pnand %p259_p0, %p253_p11 }
  0x24   :  { %263 = shalt.err (!%p260_p1)
}
  0x25   :  { %s296_s0 = smov 64   ;;  %s297_s18 = smov 4  }
  0x26   :  { %38 = dma.hbm_to_vmem [thread:$0]  %s375_s1, 128, %s33_s9, [#allocation7], %s296_s0, %s296_s0, %s297_s18  }
  0x27   :  { %286 = dma.done.wait [#allocation4], 512  }
  0x28   :  { %287 = vsyncadd [#allocation4], 4294966784 }
  0x29   :  { %288 = dma.done.wait [#allocation7], 128  }
  0x2a   :  { %289 = vsyncadd [#allocation7], 4294967168  ;;  %v219_v1 = vld [vmem:[#allocation6] sm:$0xff]   ;;  %v53_v3 = vld [vmem:[#allocation3 + $0x8] sm:$0xff]  ;;  %vm73_vm0 = vcmask 130048   ;;  %vm159_vm1 = vcmask 1041409   ;;  %v171_v42 = vlaneseq }
  0x2b   :  { %v52_v2 = vld [vmem:[#allocation3] sm:$0xff]  ;;  %v54_v4 = vld [vmem:[#allocation3 + $0x10] sm:$0xff]  ;;  %204 = vmatprep.subr.bf16.mxu0 %v219_v1  ;;  %v55_v6 = vld [vmem:[#allocation3 + $0x18] sm:$0xff]  ;;  %vm162_vm2 = vcmask 1041408   ;;  %s298_s24 = smov [#allocation8]   ;;  %vm178_vm3 = vcmask 8192  }
  0x2c   :  { %v56_v5 = vpack.c.bf16 %v53_v3, %v52_v2  ;;  %205 = vmatpush3.bf16.msra.mxu0 %v219_v1  ;;  %v57_v7 = vpack.c.bf16 %v55_v6, %v54_v4  ;;  %v166_v8 = vld [vmem:[#allocation2] sm:$0x1]  ;;  %v172_v43 = vand.u32 127, %v171_v42  ;;  %v174_v44 = vshrl.u32 %v171_v42, 7  ;;  %s186_s25 = sshll.u32 %s298_s24, 4  ;;  %s187_s25 = int_to_ptr.vmem [resolvable:$true] %s186_s25 }
  0x2d   :  { %210 = vpush %v166_v8  ;;  %v196_v9 = vld [vmem:[%s376_s2] ss:$0 sm:$0xff]  ;;  %s268_s26 = scalar_lea.vmem %s187_s25, 32  ;;  %p269_p3 = scmp.lt.s32.totalorder %s187_s25, %s187_s25 }
  0x2e   :  { %206 = vmatprep.mubr.msk.bf16.mxu0 %vm73_vm0, %v56_v5  ;;  %v200_v34 = vld [vmem:[%s377_s3] ss:$0 sm:$0xff]  ;;  %v175_v46 = vsub.s32 %v172_v43, %v174_v44  ;;  %s264_s3 = scalar_lea.vmem %s187_s25, 16 }
  0x2f   :  { %207 = vmatmul.mubr.msk.bf16.vlgmr.msra.gmra.mrb[0].mxu0 %vm73_vm0, %v57_v7  ;;  %p265_p2 = scmp.ne.s32.totalorder %s187_s25, %s264_s3  ;;  %p270_p4 = scmp.lt.s32.totalorder %s268_s26, %s264_s3 }
  0x31   :  { %p271_p5 = por %p270_p4, %p269_p3 }
  0x33   :  { %p272_p6 = pnand %p271_p5, %p265_p2 }
  0x5e   :  { %s211_s23 = spop %210 }
  0x5f   :  { %v168_v45 = vstv %s211_s23 }
 0x102   :  { %v208_v10 = vpop.f32.mrb[0].mxu0 }
 0x103   :  { %v123_v11 = vadd.f32 %v208_v10, %v196_v9  ;;  %v114_v12 = vpop.f32.mrb[1].mxu0 }
 0x104   :  { %v115_v13 = vadd.f32 %v196_v9, %v114_v12  ;;  %v209_v14 = vpop.f32.mrb[2].mxu0 }
 0x105   :  { %v126_v15 = vadd.f32 %v209_v14, %v196_v9  ;;  %v117_v16 = vpop.f32.mrb[3].mxu0  ;;  %v131_v18 = vmax.f32 %v123_v11, 0.0 }
 0x106   :  { %v118_v17 = vadd.f32 %v196_v9, %v117_v16  ;;  %v129_v20 = vmax.f32 %v115_v13, 0.0 }
 0x107   :  { %v132_v19 = vmax.f32 %v126_v15, 0.0 }
 0x108   :  { %v130_v21 = vmax.f32 %v118_v17, 0.0 }
 0x109   :  { %v140_v22 = vadd.f32 %v132_v19, %v131_v18 }
 0x10a   :  { %v133_v23 = vadd.f32 %v130_v21, %v129_v20 }
 0x10b   :  { %v141_v24 = vrot.slane %v140_v22, 4 }
 0x10c   :  { %v134_v25 = vrot.slane %v133_v23, 4 }
 0x10d   :  { %v142_v26 = vadd.f32 %v141_v24, %v140_v22 }
 0x10e   :  { %v135_v27 = vadd.f32 %v134_v25, %v133_v23 }
 0x10f   :  { %v143_v28 = vrot.slane %v142_v26, 2 }
 0x110   :  { %v136_v29 = vrot.slane %v135_v27, 2 }
 0x111   :  { %v144_v30 = vadd.f32 %v143_v28, %v142_v26 }
 0x112   :  { %v137_v31 = vadd.f32 %v136_v29, %v135_v27 }
 0x113   :  { %v145_v32 = vrot.slane %v144_v30, 1 }
 0x114   :  { %v138_v33 = vrot.slane %v137_v31, 1 }
 0x115   :  { %v146_v35 = vadd.f32 %v145_v32, %v144_v30 }
 0x116   :  { %v139_v36 = vadd.f32 %v138_v33, %v137_v31 }
 0x117   :  { %v155_v37 = vmul.f32 %v200_v34, %v146_v35 }
 0x118   :  { %v154_v38 = vmul.f32 %v200_v34, %v139_v36 }
 0x119   :  { %v158_v39 = vrot.slane %v155_v37, 7 }
 0x11b   :  { %v160_v40 = vsel %vm159_vm1, %v158_v39, %v154_v38 }
 0x11c   :  { %v163_v41 = vsel %vm162_vm2, %v160_v40, 0.0 }
 0x11d   :  { %164 = vadd.xlane.f32.xlu0 %v163_v41 }
 0x1aa   :  { %v165_v47 = vpop.xlane.xlu0 %164 }
 0x1ab   :  { %v169_v48 = vadd.f32 %v168_v45, %v165_v47 }
 0x1ad   :  { %v176_v49 = vrot.slane %v169_v48, %v175_v46 }
 0x1af   :  { %179 = vst.msk [vmem:[#allocation8] sm:$0x1] %vm178_vm3, %v176_v49 }
 0x1b0   :  { %275 = shalt.err (!%p272_p6)
}
 0x1b1   :  { %s276_s4 = scalar_lea.hbm %s379_s5, 16 }
 0x1b2   :  { %p277_p7 = scmp.ne.s32.totalorder %s379_s5, %s276_s4  ;;  %p280_p8 = scmp.lt.u32.totalorder %s276_s4, %s379_s5 }
 0x1b4   :  { %p282_p9 = pnand %p280_p8, %p277_p7 }
 0x1b6   :  { %285 = shalt.err (!%p282_p9)
}
 0x1b7   :  { %189 = dma.vmem_to_hbm [thread:$0]  %s187_s25, 16, %s379_s5, [#allocation5]  }
 0x1b8   :  { %290 = dma.done.wait [#allocation5], 16  }
 0x1b9   :  { %291 = vsyncadd [#allocation5], 4294967280 }
 0x1ba   :  { %193 = vsyncpa [#allocation4], 1 }
 0x1bb   :  { %194 = vsyncpa [#allocation7], 1 }
 0x1bc   :  { %195 = vsyncpa [#allocation5], 1 }

</bundles_post_ra>
